<compile_context>
chip_gen: v7x
topology: tpu7x:2x2x1
jax: 0.10.0
libtpu: 0.0.40
codegen_flags: <defaults>
</compile_context>

<pallas_src>
import jax
import jax.numpy as jnp
from jax.experimental import pallas as pl
from jax.experimental.pallas import tpu as pltpu

LANES = 128
SUBLANES = 8


def _round_up(x, m):
    return (x + m - 1) // m * m


def _fusion_config(d_in, n_hidden_layers, hidden, out_dim):
    """Fused lane-padded width p, layer-0 slab rows k0, and bias-fold feasibility."""
    if n_hidden_layers == 0:
        p = _round_up(max(out_dim, 1), LANES)
        fold_bias = False
    else:
        p = _round_up(max(2 * hidden, out_dim, 1), LANES)
        # Need one spare padded lane for the constant-1 bias lane.
        fold_bias = 2 * hidden < p
    k0 = _round_up(max(d_in, 1), SUBLANES)
    return p, k0, fold_bias


# ---------------------------------------------------------------------------
# Kernel
# ---------------------------------------------------------------------------
def make_fused_rnd_kernel(n_hidden_layers, p, d_in, k0, fold_bias, compute_dtype):
    """Fused (f || f_hat) MLP; the final matmul produces d = f(x) - f_hat(x)."""
    L = n_hidden_layers

    def kernel(x_ref, w_ref, b_ref, out_ref):
        x = x_ref[...]                                      # (tile_n, d_in) f32
        # Layer 0: f32 inputs (exact first layer), tiny K = d_in.
        w0 = w_ref[:d_in, :].astype(jnp.float32)            # (d_in, P) small upcast
        z = jnp.dot(x, w0, preferred_element_type=jnp.float32) + b_ref[0:1, :]
        if L == 0:
            d = z
        else:
            h = jnp.maximum(z, 0.0).astype(compute_dtype)
            for li in range(1, L):                          # interior fused layers
                w = w_ref[k0 + (li - 1) * p:k0 + li * p, :]
                z = jnp.dot(h, w, preferred_element_type=jnp.float32)
                if not fold_bias:
                    z = z + b_ref[li:li + 1, :]
                h = jnp.maximum(z, 0.0).astype(compute_dtype)
            wf = w_ref[k0 + (L - 1) * p:k0 + L * p, :]      # [[W_f]; [-W_fhat]] (+bias row)
            d = jnp.dot(h, wf, preferred_element_type=jnp.float32)
            if not fold_bias:
                d = d + b_ref[L:L + 1, :]
        # Padded lanes of d are exactly zero by construction, so the full-lane
        # reduction equals the true squared norm.  Store lane-dense (1, tile_n).
        out_ref[...] = jnp.sqrt(jnp.sum(d * d, axis=1))[None, :]

    return kernel


# ---------------------------------------------------------------------------
# Parameter fusion / packing (host-side, done once)
# ---------------------------------------------------------------------------
def pack_fused_params(f_params, fh_params, n_hidden_layers, d_in, hidden, out_dim,
                      p, k0, fold_bias, compute_dtype=jnp.bfloat16):
    """Pack both networks into one weight slab (k0 + L*p, p) + one bias slab."""
    L, H, O = n_hidden_layers, hidden, out_dim

    if L == 0:
        w = jnp.zeros((k0, p), jnp.float32)
        w = w.at[:d_in, :O].set(f_params[0] - fh_params[0])
        b = jnp.zeros((1, p), jnp.float32)
        b = b.at[:, :O].set(f_params[1] - fh_params[1])
        return w.astype(compute_dtype), b

    c = 2 * H                       # constant-1 "bias lane" column (padded, unused)
    w_blocks, b_rows = [], []

    # Layer 0: f / f_hat concatenated along outputs; its bias stays explicit
    # (x carries no 1-lane) and also seeds the bias lane for all later layers.
    w0 = jnp.zeros((k0, p), jnp.float32)
    w0 = w0.at[:d_in, :H].set(f_params[0])
    w0 = w0.at[:d_in, H:2 * H].set(fh_params[0])
    b0 = jnp.zeros((1, p), jnp.float32)
    b0 = b0.at[:, :H].set(f_params[1])
    b0 = b0.at[:, H:2 * H].set(fh_params[1])
    if fold_bias:
        b0 = b0.at[:, c].set(1.0)   # relu(1) = 1 -> bias lane carried forward
    w_blocks.append(w0)
    b_rows.append(b0)

    # Interior layers: block-diagonal; biases folded into the bias-lane weight row.
    for li in range(1, L):
        w = jnp.zeros((p, p), jnp.float32)
        w = w.at[:H, :H].set(f_params[2 * li])
        w = w.at[H:2 * H, H:2 * H].set(fh_params[2 * li])
        if fold_bias:
            w = w.at[c, :H].set(f_params[2 * li + 1][0])
            w = w.at[c, H:2 * H].set(fh_params[2 * li + 1][0])
            w = w.at[c, c].set(1.0)                 # keep the bias lane alive
        else:
            b = jnp.zeros((1, p), jnp.float32)
            b = b.at[:, :H].set(f_params[2 * li + 1])
            b = b.at[:, H:2 * H].set(fh_params[2 * li + 1])
            b_rows.append(b)
        w_blocks.append(w)

    # Final layer: stacked with negated f_hat weights; bias difference folded into
    # the bias-lane row.  Column c (and all columns >= O) are zero -> padded output
    # lanes of d are exactly zero.
    wf = jnp.zeros((p, p), jnp.float32)
    wf = wf.at[:H, :O].set(f_params[2 * L])
    wf = wf.at[H:2 * H, :O].set(-fh_params[2 * L])
    bfin = f_params[2 * L + 1] - fh_params[2 * L + 1]
    if fold_bias:
        wf = wf.at[c, :O].set(bfin[0])
    else:
        b = jnp.zeros((1, p), jnp.float32)
        b = b.at[:, :O].set(bfin)
        b_rows.append(b)
    w_blocks.append(wf)

    w_all = jnp.concatenate(w_blocks, axis=0).astype(compute_dtype)  # (k0 + L*p, p)
    b_all = jnp.concatenate(b_rows, axis=0)                          # (1 or L+1, p) f32
    return w_all, b_all


# ---------------------------------------------------------------------------
# Wrapper
# ---------------------------------------------------------------------------
def rnd_distillation_forward(x, f_params, fh_params, n_hidden_layers,
                             rnd_nb_hidden, rnd_nb_output,
                             compute_dtype=jnp.bfloat16, tile_n=None):
    """errors = ||f(x) - f_hat(x)||_2 per row, via one fused Pallas call."""
    n, d_in = x.shape
    L = n_hidden_layers
    p, k0, fold_bias = _fusion_config(d_in, L, rnd_nb_hidden, rnd_nb_output)

    # Row tiling: large tiles amortize per-grid-step overhead; capped at 1024 to stay
    # out of the vreg-spill regime (esp. v5e's single vst slot).  Small batches take a
    # single exact-fit block (rows rounded only to a sublane multiple, no 128 padding).
    if tile_n is None:
        tile_n = 1024 if p <= 256 else 512
    if n <= tile_n:
        tile_n = _round_up(max(n, 1), SUBLANES)
        n_rows = tile_n
    else:
        assert tile_n % LANES == 0, (
            "multi-block tile_n must be a multiple of 128 (lane-dense output blocks)")
        n_rows = n          # non-dividing last tile handled by Pallas partial blocks

    n_blocks = pl.cdiv(n_rows, tile_n)

    w_all, b_all = pack_fused_params(f_params, fh_params, L, d_in, rnd_nb_hidden,
                                     rnd_nb_output, p, k0, fold_bias, compute_dtype)

    # x stays at its natural (n, d_in) shape / f32 dtype: no host feature-pad/cast
    # pass over HBM.  Only the tiny single-block path pads rows (at most +7 rows).
    x_in = x if x.dtype == jnp.float32 else x.astype(jnp.float32)
    if n_rows != n:
        x_in = jnp.zeros((n_rows, d_in), jnp.float32).at[:n, :].set(x_in)

    w_bytes = int(w_all.size) * jnp.dtype(compute_dtype).itemsize
    b_bytes = int(b_all.size) * 4
    # Explicit VMEM budget (v7x: 64 MiB physical / 32 MiB default-scoped).
    vmem_need = (2 * tile_n * d_in * 4 + 2 * (w_bytes + b_bytes)
                 + 2 * tile_n * 4 + 8 * tile_n * p)
    vmem_limit = int(min(max(2 * vmem_need, 16 << 20), 48 << 20))

    mm_flops = 2 * n_rows * d_in * p + (2 * n_rows * p * p * L if L else 0)
    cost = pl.CostEstimate(
        flops=int(mm_flops + 4 * n_rows * p),
        transcendentals=int(n_rows),
        bytes_accessed=int(n_rows * d_in * 4 + w_bytes + b_bytes + n_rows * 4))

    kernel = make_fused_rnd_kernel(L, p, d_in, k0, fold_bias, compute_dtype)

    def build(resident_mode):
        def resident(shape):
            if resident_mode is None:
                return pl.BlockSpec(shape, lambda i: (0, 0))
            return pl.BlockSpec(shape, lambda i: (0, 0), pipeline_mode=resident_mode)
        return pl.pallas_call(
            kernel,
            out_shape=jax.ShapeDtypeStruct((1, n_rows), jnp.float32),
            grid_spec=pltpu.PrefetchScalarGridSpec(
                num_scalar_prefetch=0,
                grid=(n_blocks,),
                in_specs=[
                    pl.BlockSpec((tile_n, d_in), lambda i: (i, 0)),   # x row tile (f32)
                    resident(tuple(w_all.shape)),                     # weight slab
                    resident(tuple(b_all.shape)),                     # bias slab
                ],
                out_specs=pl.BlockSpec((1, tile_n), lambda i: (0, i)),  # lane-dense out
            ),
            compiler_params=pltpu.CompilerParams(
                dimension_semantics=("parallel",),
                vmem_limit_bytes=vmem_limit),
            cost_estimate=cost)

    try:
        # Resident slabs have a constant index map -> single-buffer them to halve
        # their VMEM footprint (v7x budget).
        out = build(pl.Buffered(1))(x_in, w_all, b_all)
    except Exception:
        # pipeline_mode / Buffered(1) not supported on this JAX build: fall back to
        # default (double-buffered) resident slabs.
        out = build(None)(x_in, w_all, b_all)
    return out[0, :n]


# ---------------------------------------------------------------------------
# Init + references
# ---------------------------------------------------------------------------
def init_random_network_params(key, input_dim, rnd_nb_layers, rnd_nb_hidden,
                               rnd_nb_output, method):
    """Flat list [W1, b1, ..., Wfinal, bfinal]; W stored [in, out]."""
    params = []
    in_dim = input_dim
    for _ in range(rnd_nb_layers):
        key, kw, kb = jax.random.split(key, 3)
        if method == "uniform":
            w = jax.random.uniform(kw, (in_dim, rnd_nb_hidden), jnp.float32)
            b = jax.random.uniform(kb, (1, rnd_nb_hidden), jnp.float32)
        else:  # "normal"
            w = jax.random.normal(kw, (in_dim, rnd_nb_hidden), jnp.float32)
            b = jax.random.normal(kb, (1, rnd_nb_hidden), jnp.float32)
        params += [w, b]
        in_dim = rnd_nb_hidden
    key, kw, kb = jax.random.split(key, 3)
    bound = 1.0 / jnp.sqrt(jnp.float32(in_dim))
    wf = jax.random.uniform(kw, (in_dim, rnd_nb_output), jnp.float32,
                            minval=-bound, maxval=bound)
    bf = jax.random.uniform(kb, (1, rnd_nb_output), jnp.float32,
                            minval=-bound, maxval=bound)
    params += [wf, bf]
    return params


def reference_forward(x, f_params, fh_params, n_hidden_layers):
    """Original (unfused, f32) module semantics."""
    def mlp(params):
        h = x
        for li in range(n_hidden_layers):
            h = jnp.maximum(h @ params[2 * li] + params[2 * li + 1], 0.0)
        return h @ params[2 * n_hidden_layers] + params[2 * n_hidden_layers + 1]
    d = mlp(f_params) - mlp(fh_params)
    return jnp.sqrt(jnp.sum(d * d, axis=1))


def reference_fused(x, w_all, b_all, n_hidden_layers, d_in, p, k0, fold_bias):
    """Pure-JAX replica of the fused kernel math (same dtype flow / packing)."""
    L = n_hidden_layers
    cdt = w_all.dtype
    w0 = w_all[:d_in].astype(jnp.float32)
    z = jnp.dot(x.astype(jnp.float32), w0, preferred_element_type=jnp.float32,
                precision=jax.lax.Precision.HIGHEST) + b_all[0:1]
    if L == 0:
        d = z
    else:
        h = jnp.maximum(z, 0.0).astype(cdt)
        for li in range(1, L):
            w = w_all[k0 + (li - 1) * p:k0 + li * p]
            z = jnp.dot(h, w, preferred_element_type=jnp.float32)
            if not fold_bias:
                z = z + b_all[li:li + 1]
            h = jnp.maximum(z, 0.0).astype(cdt)
        wf = w_all[k0 + (L - 1) * p:k0 + L * p]
        d = jnp.dot(h, wf, preferred_element_type=jnp.float32)
        if not fold_bias:
            d = d + b_all[L:L + 1]
    return jnp.sqrt(jnp.sum(d * d, axis=1))


# ---------------------------------------------------------------------------
if __name__ == "__main__":
    # Config implied by the module (gnn_nb_layers=0 so in_dim = input_dim).
    input_dim = 16
    rnd_nb_layers = 2
    rnd_nb_hidden = 32
    rnd_nb_output = 16

    key = jax.random.PRNGKey(0)
    kx1, kx2, kf, kfh = jax.random.split(key, 4)

    f_params = init_random_network_params(
        kf, input_dim, rnd_nb_layers, rnd_nb_hidden, rnd_nb_output, "uniform")
    fh_params = init_random_network_params(
        kfh, input_dim, rnd_nb_layers, rnd_nb_hidden, rnd_nb_output, "normal")

    p, k0, fold_bias = _fusion_config(input_dim, rnd_nb_layers,
                                      rnd_nb_hidden, rnd_nb_output)
    w_all, b_all = pack_fused_params(f_params, fh_params, rnd_nb_layers, input_dim,
                                     rnd_nb_hidden, rnd_nb_output, p, k0, fold_bias)

    # --- small-batch path: single exact-fit block, no 128-row padding -------------
    N1 = 8
    x1 = jax.random.normal(kx1, (N1, input_dim), jnp.float32)
    err1 = jax.block_until_ready(
        rnd_distillation_forward(x1, f_params, fh_params, rnd_nb_layers,
                                 rnd_nb_hidden, rnd_nb_output))
    assert err1.shape == (N1,)
    ref1 = reference_fused(x1, w_all, b_all, rnd_nb_layers, input_dim, p, k0, fold_bias)
    assert jnp.allclose(err1, ref1, rtol=1e-2, atol=1e-2), (err1, ref1)
    ref1_f32 = reference_forward(x1, f_params, fh_params, rnd_nb_layers)
    assert jnp.allclose(err1, ref1_f32, rtol=1e-1, atol=1e-1), (err1, ref1_f32)

    # --- multi-block path: partial last tile, lane-dense 128-wide output blocks ---
    N2 = 300
    x2 = jax.random.normal(kx2, (N2, input_dim), jnp.float32)
    err2 = jax.block_until_ready(
        rnd_distillation_forward(x2, f_params, fh_params, rnd_nb_layers,
                                 rnd_nb_hidden, rnd_nb_output, tile_n=128))
    assert err2.shape == (N2,)
    ref2 = reference_fused(x2, w_all, b_all, rnd_nb_layers, input_dim, p, k0, fold_bias)
    assert jnp.allclose(err2, ref2, rtol=1e-2, atol=1e-2), (err2, ref2)
    ref2_f32 = reference_forward(x2, f_params, fh_params, rnd_nb_layers)
    assert jnp.allclose(err2, ref2_f32, rtol=1e-1, atol=1e-1), (err2, ref2_f32)

    print("KERNEL_OK")
</pallas_src>

<mosaic_0001>
module attributes {stable_mosaic.version = 11 : i64} {
  func.func @kernel(%arg0: i32, %arg1: memref<8x16xf32, #tpu.memory_space<vmem>>, %arg2: memref<272x128xbf16, #tpu.memory_space<vmem>>, %arg3: memref<1x128xf32, #tpu.memory_space<vmem>>, %arg4: memref<1x8xf32, #tpu.memory_space<vmem>>) attributes {dimension_semantics = [#tpu.dimension_semantics<parallel>], iteration_bounds = array<i64: 1>, scalar_prefetch = 0 : i64, scratch_operands = 0 : i64, tpu.core_type = #tpu.core_type<tc>, window_params = [{transform_indices = @transform_0, window_bounds = array<i64: 8, 16>}, {pipeline_mode = #tpu.pipeline_mode<synchronous>, transform_indices = @transform_1, window_bounds = array<i64: 272, 128>}, {pipeline_mode = #tpu.pipeline_mode<synchronous>, transform_indices = @transform_2, window_bounds = array<i64: 1, 128>}, {transform_indices = @transform_3, window_bounds = array<i64: 1, 8>}]} {
    %c0 = arith.constant 0 : index
    %c0_0 = arith.constant 0 : index
    %0 = vector.load %arg1[%c0, %c0_0] : memref<8x16xf32, #tpu.memory_space<vmem>>, vector<8x16xf32>
    %c0_1 = arith.constant 0 : index
    %c0_2 = arith.constant 0 : index
    %1 = vector.load %arg2[%c0_1, %c0_2] : memref<272x128xbf16, #tpu.memory_space<vmem>>, vector<16x128xbf16>
    %2 = arith.extf %1 : vector<16x128xbf16> to vector<16x128xf32>
    %cst = arith.constant dense<0.000000e+00> : vector<8x128xf32>
    %3 = tpu.matmul %0, %2, %cst {dimension_numbers = #tpu.dot_dimension_numbers<[1], [0], [0], [1], [0, 0, 1, 1], [], []>} : vector<8x16xf32>, vector<16x128xf32>, vector<8x128xf32> -> vector<8x128xf32>
    %c0_3 = arith.constant 0 : index
    %c0_4 = arith.constant 0 : index
    %4 = vector.load %arg3[%c0_3, %c0_4] : memref<1x128xf32, #tpu.memory_space<vmem>>, vector<1x128xf32>
    %5 = vector.broadcast %4 : vector<1x128xf32> to vector<8x128xf32>
    %6 = arith.addf %3, %5 : vector<8x128xf32>
    %cst_5 = arith.constant 0.000000e+00 : f32
    %7 = vector.broadcast %cst_5 : f32 to vector<8x128xf32>
    %8 = arith.maximumf %6, %7 : vector<8x128xf32>
    %9 = arith.truncf %8 : vector<8x128xf32> to vector<8x128xbf16>
    %c16 = arith.constant 16 : index
    %c0_6 = arith.constant 0 : index
    %10 = vector.load %arg2[%c16, %c0_6] : memref<272x128xbf16, #tpu.memory_space<vmem>>, vector<128x128xbf16>
    %cst_7 = arith.constant dense<0.000000e+00> : vector<8x128xf32>
    %11 = tpu.matmul %9, %10, %cst_7 {dimension_numbers = #tpu.dot_dimension_numbers<[1], [0], [0], [1], [0, 0, 1, 1], [], []>} : vector<8x128xbf16>, vector<128x128xbf16>, vector<8x128xf32> -> vector<8x128xf32>
    %cst_8 = arith.constant 0.000000e+00 : f32
    %12 = vector.broadcast %cst_8 : f32 to vector<8x128xf32>
    %13 = arith.maximumf %11, %12 : vector<8x128xf32>
    %14 = arith.truncf %13 : vector<8x128xf32> to vector<8x128xbf16>
    %c144 = arith.constant 144 : index
    %c0_9 = arith.constant 0 : index
    %15 = vector.load %arg2[%c144, %c0_9] : memref<272x128xbf16, #tpu.memory_space<vmem>>, vector<128x128xbf16>
    %cst_10 = arith.constant dense<0.000000e+00> : vector<8x128xf32>
    %16 = tpu.matmul %14, %15, %cst_10 {dimension_numbers = #tpu.dot_dimension_numbers<[1], [0], [0], [1], [0, 0, 1, 1], [], []>} : vector<8x128xbf16>, vector<128x128xbf16>, vector<8x128xf32> -> vector<8x128xf32>
    %17 = arith.mulf %16, %16 : vector<8x128xf32>
    %cst_11 = arith.constant dense<0.000000e+00> : vector<8xf32>
    %18 = vector.multi_reduction <add>, %17, %cst_11 [1] : vector<8x128xf32> to vector<8xf32>
    %19 = math.sqrt %18 : vector<8xf32>
    %20 = vector.shape_cast %19 : vector<8xf32> to vector<1x8xf32>
    %c0_12 = arith.constant 0 : index
    %c0_13 = arith.constant 0 : index
    %21 = vector.load %arg4[%c0_12, %c0_13] : memref<1x8xf32, #tpu.memory_space<vmem>>, vector<1x8xf32>
    tpu.vector_store %arg4[%c0_12, %c0_13], %20 {strides = array<i32>} : memref<1x8xf32, #tpu.memory_space<vmem>>, vector<1x8xf32>,
    return
  }
  func.func @transform_0(%arg0: i32) -> (i32, i32) {
    %c0_i32 = arith.constant 0 : i32
    %c0_i32_0 = arith.constant 0 : i32
    return %arg0, %c0_i32 : i32, i32
  }
  func.func @transform_1(%arg0: i32) -> (i32, i32) {
    %c0_i32 = arith.constant 0 : i32
    %c0_i32_0 = arith.constant 0 : i32
    %c0_i32_1 = arith.constant 0 : i32
    return %c0_i32, %c0_i32_0 : i32, i32
  }
  func.func @transform_2(%arg0: i32) -> (i32, i32) {
    %c0_i32 = arith.constant 0 : i32
    %c0_i32_0 = arith.constant 0 : i32
    %c0_i32_1 = arith.constant 0 : i32
    return %c0_i32, %c0_i32_0 : i32, i32
  }
  func.func @transform_3(%arg0: i32) -> (i32, i32) {
    %c0_i32 = arith.constant 0 : i32
    %c0_i32_0 = arith.constant 0 : i32
    return %c0_i32, %arg0 : i32, i32
  }
}

module attributes {stable_mosaic.version = 11 : i64} {
  func.func @kernel(%arg0: i32, %arg1: memref<8x16xf32, #tpu.memory_space<vmem>>, %arg2: memref<272x128xbf16, #tpu.memory_space<vmem>>, %arg3: memref<1x128xf32, #tpu.memory_space<vmem>>, %arg4: memref<1x8xf32, #tpu.memory_space<vmem>>) attributes {dimension_semantics = [#tpu.dimension_semantics<parallel>], iteration_bounds = array<i64: 1>, scalar_prefetch = 0 : i64, scratch_operands = 0 : i64, tpu.core_type = #tpu.core_type<tc>, window_params = [{transform_indices = @transform_0, window_bounds = array<i64: 8, 16>}, {pipeline_mode = #tpu.pipeline_mode<synchronous>, transform_indices = @transform_1, window_bounds = array<i64: 272, 128>}, {pipeline_mode = #tpu.pipeline_mode<synchronous>, transform_indices = @transform_2, window_bounds = array<i64: 1, 128>}, {transform_indices = @transform_3, window_bounds = array<i64: 1, 8>}]} {
    %c0 = arith.constant 0 : index
    %c0_0 = arith.constant 0 : index
    %0 = vector.load %arg1[%c0, %c0_0] : memref<8x16xf32, #tpu.memory_space<vmem>>, vector<8x16xf32>
    %c0_1 = arith.constant 0 : index
    %c0_2 = arith.constant 0 : index
    %1 = vector.load %arg2[%c0_1, %c0_2] : memref<272x128xbf16, #tpu.memory_space<vmem>>, vector<16x128xbf16>
    %2 = arith.extf %1 : vector<16x128xbf16> to vector<16x128xf32>
    %cst = arith.constant dense<0.000000e+00> : vector<8x128xf32>
    %3 = tpu.matmul %0, %2, %cst {dimension_numbers = #tpu.dot_dimension_numbers<[1], [0], [0], [1], [0, 0, 1, 1], [], []>} : vector<8x16xf32>, vector<16x128xf32>, vector<8x128xf32> -> vector<8x128xf32>
    %c0_3 = arith.constant 0 : index
    %c0_4 = arith.constant 0 : index
    %4 = vector.load %arg3[%c0_3, %c0_4] : memref<1x128xf32, #tpu.memory_space<vmem>>, vector<1x128xf32>
    %5 = vector.broadcast %4 : vector<1x128xf32> to vector<8x128xf32>
    %6 = arith.addf %3, %5 : vector<8x128xf32>
    %cst_5 = arith.constant 0.000000e+00 : f32
    %7 = vector.broadcast %cst_5 : f32 to vector<8x128xf32>
    %8 = arith.maximumf %6, %7 : vector<8x128xf32>
    %9 = arith.truncf %8 : vector<8x128xf32> to vector<8x128xbf16>
    %c16 = arith.constant 16 : index
    %c0_6 = arith.constant 0 : index
    %10 = vector.load %arg2[%c16, %c0_6] : memref<272x128xbf16, #tpu.memory_space<vmem>>, vector<128x128xbf16>
    %cst_7 = arith.constant dense<0.000000e+00> : vector<8x128xf32>
    %11 = tpu.matmul %9, %10, %cst_7 {dimension_numbers = #tpu.dot_dimension_numbers<[1], [0], [0], [1], [0, 0, 1, 1], [], []>} : vector<8x128xbf16>, vector<128x128xbf16>, vector<8x128xf32> -> vector<8x128xf32>
    %cst_8 = arith.constant 0.000000e+00 : f32
    %12 = vector.broadcast %cst_8 : f32 to vector<8x128xf32>
    %13 = arith.maximumf %11, %12 : vector<8x128xf32>
    %14 = arith.truncf %13 : vector<8x128xf32> to vector<8x128xbf16>
    %c144 = arith.constant 144 : index
    %c0_9 = arith.constant 0 : index
    %15 = vector.load %arg2[%c144, %c0_9] : memref<272x128xbf16, #tpu.memory_space<vmem>>, vector<128x128xbf16>
    %cst_10 = arith.constant dense<0.000000e+00> : vector<8x128xf32>
    %16 = tpu.matmul %14, %15, %cst_10 {dimension_numbers = #tpu.dot_dimension_numbers<[1], [0], [0], [1], [0, 0, 1, 1], [], []>} : vector<8x128xbf16>, vector<128x128xbf16>, vector<8x128xf32> -> vector<8x128xf32>
    %17 = arith.mulf %16, %16 : vector<8x128xf32>
    %cst_11 = arith.constant dense<0.000000e+00> : vector<8xf32>
    %18 = vector.multi_reduction <add>, %17, %cst_11 [1] : vector<8x128xf32> to vector<8xf32>
    %19 = math.sqrt %18 : vector<8xf32>
    %20 = vector.shape_cast %19 : vector<8xf32> to vector<1x8xf32>
    %c0_12 = arith.constant 0 : index
    %c0_13 = arith.constant 0 : index
    %21 = vector.load %arg4[%c0_12, %c0_13] : memref<1x8xf32, #tpu.memory_space<vmem>>, vector<1x8xf32>
    tpu.vector_store %arg4[%c0_12, %c0_13], %20 {strides = array<i32>} : memref<1x8xf32, #tpu.memory_space<vmem>>, vector<1x8xf32>,
    return
  }
  func.func @transform_0(%arg0: i32) -> (i32, i32) {
    %c0_i32 = arith.constant 0 : i32
    %c0_i32_0 = arith.constant 0 : i32
    return %arg0, %c0_i32 : i32, i32
  }
  func.func @transform_1(%arg0: i32) -> (i32, i32) {
    %c0_i32 = arith.constant 0 : i32
    %c0_i32_0 = arith.constant 0 : i32
    %c0_i32_1 = arith.constant 0 : i32
    return %c0_i32, %c0_i32_0 : i32, i32
  }
  func.func @transform_2(%arg0: i32) -> (i32, i32) {
    %c0_i32 = arith.constant 0 : i32
    %c0_i32_0 = arith.constant 0 : i32
    %c0_i32_1 = arith.constant 0 : i32
    return %c0_i32, %c0_i32_0 : i32, i32
  }
  func.func @transform_3(%arg0: i32) -> (i32, i32) {
    %c0_i32 = arith.constant 0 : i32
    %c0_i32_0 = arith.constant 0 : i32
    return %c0_i32, %arg0 : i32, i32
  }
}

</mosaic_0001>

<bundles_post_ra>
// kernel: tpu_custom_call.1
= control target key start
LH: loop header
LB: loop body
LE: loop exit
PB: predicated region body
PF: predicated region fallthrough
CT: control target
= control target key end

     0   :  { %8 = vsyncpa [#allocation3], 0  ;;  %s641_s0 = inlined_call_operand.hbm [shape: f32[8,16], index: 0, kind: input, shape index: {}]   ;;  %s642_s1 = inlined_call_operand.hbm [shape: bf16[272,128], index: 1, kind: input, shape index: {}]   ;;  %s643_s2 = inlined_call_operand.vmem [shape: f32[1,128], index: 2, kind: input, shape index: {}]   ;;  %s644_s3 = inlined_call_operand.hbm [shape: f32[1,8], index: 3, kind: output, shape index: {}]  }
   0x1   :  { %9 = vsyncpa [#allocation6], 0 }
   0x2   :  { %10 = vsyncpa [#allocation4], 0  ;;  %s567_s12 = smov [#allocation2]   ;;  %s568_s14 = smov [#allocation5]  }
   0x3   :  { %s17_s13 = sshll.u32 %s567_s12, 4  ;;  %s26_s15 = sshll.u32 %s568_s14, 4  ;;  %s18_s13 = int_to_ptr.vmem [resolvable:$true] %s17_s13  ;;  %s595_s15 = int_to_ptr.vmem [resolvable:$true] %s26_s15 }
   0x4   :  { %s495_s18 = scalar_lea.hbm %s641_s0, 128 }
   0x5   :  { %p496_p0 = scmp.ne.s32.totalorder %s641_s0, %s495_s18  ;;  %p499_p1 = scmp.lt.u32.totalorder %s495_s18, %s641_s0 }
   0x7   :  { %p501_p2 = pnand %p499_p1, %p496_p0 }
   0x9   :  { %504 = shalt.err (!%p501_p2)
}
   0xa   :  { %s505_s23 = scalar_lea.vmem %s18_s13, 128  ;;  %p510_p4 = scmp.lt.s32.totalorder %s18_s13, %s18_s13 }
   0xb   :  { %p506_p3 = scmp.ne.s32.totalorder %s18_s13, %s505_s23  ;;  %p511_p5 = scmp.lt.s32.totalorder %s505_s23, %s505_s23 }
   0xd   :  { %p512_p6 = por %p511_p5, %p510_p4 }
   0xf   :  { %p513_p7 = pnand %p512_p6, %p506_p3 }
  0x11   :  { %516 = shalt.err (!%p513_p7)
}
  0x12   :  { %20 = dma.hbm_to_vmem [thread:$0]  %s641_s0, 128, %s18_s13, [#allocation3]  }
  0x13   :  { %s517_s28 = scalar_lea.hbm %s642_s1, 2176 }
  0x14   :  { %p518_p8 = scmp.ne.s32.totalorder %s642_s1, %s517_s28  ;;  %p521_p9 = scmp.lt.u32.totalorder %s517_s28, %s642_s1 }
  0x16   :  { %p523_p10 = pnand %p521_p9, %p518_p8 }
  0x18   :  { %526 = shalt.err (!%p523_p10)
}
  0x19   :  { %s527_s6 = scalar_lea.vmem %s595_s15, 2176  ;;  %p532_p12 = scmp.lt.s32.totalorder %s595_s15, %s595_s15 }
  0x1a   :  { %p528_p11 = scmp.ne.s32.totalorder %s595_s15, %s527_s6  ;;  %p533_p13 = scmp.lt.s32.totalorder %s527_s6, %s527_s6 }
  0x1c   :  { %p534_p0 = por %p533_p13, %p532_p12 }
  0x1e   :  { %p535_p1 = pnand %p534_p0, %p528_p11 }
  0x20   :  { %538 = shalt.err (!%p535_p1)
}
  0x21   :  { %s569_s0 = smov 64   ;;  %s570_s7 = smov 4  }
  0x22   :  { %32 = dma.hbm_to_vmem [thread:$0]  %s642_s1, 2176, %s595_s15, [#allocation6], %s569_s0, %s569_s0, %s570_s7  }
  0x23   :  { %561 = dma.done.wait [#allocation3], 128  }
  0x24   :  { %562 = vsyncadd [#allocation3], 4294967168 }
  0x25   :  { %563 = dma.done.wait [#allocation6], 2176  }
  0x26   :  { %564 = vsyncadd [#allocation6], 4294965120  ;;  %v571_v0 = vmov 0.0|0.0   ;;  %vm572_vm0 = vmmov 0   ;;  %v573_v1 = vmov 0.0   ;;  %v395_v2 = vld [vmem:[#allocation5] sm:$0xff]   ;;  %v351_v38 = vlaneseq }
  0x27   :  { %466 = vmatprep.subr.bf16.mxu0 %v571_v0  ;;  %423 = vmatprep.mubr.msk.f32.mxu0 %vm572_vm0, %v573_v1  ;;  %v42_v3 = vld [vmem:[#allocation2] sm:$0xff]  ;;  %vm54_vm1 = vcmask 130048   ;;  %v477_v4 = vld [vmem:[#allocation5 + $0x8] sm:$0xff]   ;;  %v478_v5 = vld [vmem:[#allocation5 + $0x10] sm:$0xff]   ;;  %vm358_vm4 = vcmask 57344  }
  0x28   :  { %426 = vmatprep.subr.bf16.mxu1 %v573_v1  ;;  %442 = vmatprep.mubr.msk.bf16.mxu1 %vm572_vm0, %v573_v1  ;;  %v479_v6 = vld [vmem:[#allocation5 + $0x18] sm:$0xff]   ;;  %v480_v7 = vld [vmem:[#allocation5 + $0x20] sm:$0xff]   ;;  %v481_v8 = vld [vmem:[#allocation5 + $0x28] sm:$0xff]   ;;  %v352_v39 = vand.u32 127, %v351_v38  ;;  %v354_v40 = vshrl.u32 %v351_v38, 7 }
  0x29   :  { %468 = vmatpush3.bf16.msra.mxu0 %v395_v2  ;;  %427 = vmatpush3.bf16.msra.mxu1 %v477_v4  ;;  %v482_v9 = vld [vmem:[#allocation5 + $0x30] sm:$0xff]   ;;  %v483_v10 = vld [vmem:[#allocation5 + $0x38] sm:$0xff]   ;;  %v484_v11 = vld [vmem:[#allocation5 + $0x40] sm:$0xff]  }
  0x2a   :  { %446 = vmatprep.subr.bf16.mxu0 %v573_v1  ;;  %428 = vmatprep.subr.bf16.mxu1 %v573_v1  ;;  %v485_v12 = vld [vmem:[#allocation5 + $0x48] sm:$0xff]   ;;  %v486_v13 = vld [vmem:[#allocation5 + $0x50] sm:$0xff]   ;;  %v487_v14 = vld [vmem:[#allocation5 + $0x58] sm:$0xff]   ;;  %v355_v43 = vsub.s32 %v352_v39, %v354_v40 }
  0x2b   :  { %v488_v15 = vld [vmem:[#allocation5 + $0x60] sm:$0xff]   ;;  %v489_v16 = vld [vmem:[#allocation5 + $0x68] sm:$0xff]   ;;  %v490_v17 = vld [vmem:[#allocation5 + $0x70] sm:$0xff]  }
  0x2c   :  { %424 = vmatmul.mubr.msk.f32.vlgmr.msra.gmra.mrb[0].mxu0 %vm54_vm1, %v42_v3  ;;  %v491_v18 = vld [vmem:[#allocation5 + $0x78] sm:$0xff]   ;;  %v492_v25 = vld [vmem:[#allocation5 + $0x80] sm:$0xff]  }
  0x2d   :  { %462 = vmatprep.mubr.msk.bf16.mxu0 %vm572_vm0, %v573_v1  ;;  %429 = vmatpush3.bf16.msra.mxu1 %v478_v5  ;;  %v376_v19 = vld [vmem:[%s643_s2] ss:$0 sm:$0xff]  ;;  %s574_s2 = smov [#allocation7]  }
  0x2e   :  { %430 = vmatprep.subr.bf16.mxu1 %v573_v1  ;;  %447 = vmatpush3.bf16.msra.mxu0 %v485_v12  ;;  %s366_s11 = sshll.u32 %s574_s2, 4  ;;  %s367_s11 = int_to_ptr.vmem [resolvable:$true] %s366_s11 }
  0x2f   :  { %448 = vmatprep.subr.bf16.mxu0 %v573_v1  ;;  %s539_s12 = scalar_lea.vmem %s367_s11, 16  ;;  %s543_s13 = scalar_lea.vmem %s367_s11, 32 }
  0x30   :  { %p540_p2 = scmp.ne.s32.totalorder %s367_s11, %s539_s12  ;;  %p544_p3 = scmp.lt.s32.totalorder %s367_s11, %s367_s11 }
  0x31   :  { %431 = vmatpush3.bf16.msra.mxu1 %v479_v6  ;;  %p545_p4 = scmp.lt.s32.totalorder %s543_s13, %s539_s12 }
  0x32   :  { %432 = vmatprep.subr.bf16.mxu1 %v573_v1  ;;  %449 = vmatpush3.bf16.msra.mxu0 %v486_v13 }
  0x33   :  { %450 = vmatprep.subr.bf16.mxu0 %v573_v1  ;;  %p546_p5 = por %p545_p4, %p544_p3 }
  0x35   :  { %433 = vmatpush3.bf16.msra.mxu1 %v480_v7  ;;  %p547_p6 = pnand %p546_p5, %p540_p2 }
  0x36   :  { %434 = vmatprep.subr.bf16.mxu1 %v573_v1  ;;  %451 = vmatpush3.bf16.msra.mxu0 %v487_v14 }
  0x37   :  { %452 = vmatprep.subr.bf16.mxu0 %v573_v1 }
  0x39   :  { %435 = vmatpush3.bf16.msra.mxu1 %v481_v8 }
  0x3a   :  { %436 = vmatprep.subr.bf16.mxu1 %v573_v1  ;;  %453 = vmatpush3.bf16.msra.mxu0 %v488_v15 }
  0x3b   :  { %454 = vmatprep.subr.bf16.mxu0 %v573_v1 }
  0x3d   :  { %437 = vmatpush3.bf16.msra.mxu1 %v482_v9 }
  0x3e   :  { %438 = vmatprep.subr.bf16.mxu1 %v573_v1  ;;  %455 = vmatpush3.bf16.msra.mxu0 %v489_v16 }
  0x3f   :  { %456 = vmatprep.subr.bf16.mxu0 %v573_v1 }
  0x41   :  { %439 = vmatpush3.bf16.msra.mxu1 %v483_v10 }
  0x42   :  { %440 = vmatprep.subr.bf16.mxu1 %v573_v1  ;;  %457 = vmatpush3.bf16.msra.mxu0 %v490_v17 }
  0x43   :  { %458 = vmatprep.subr.bf16.mxu0 %v573_v1 }
  0x45   :  { %441 = vmatpush3.bf16.msra.mxu1 %v484_v11 }
  0x46   :  { %459 = vmatpush3.bf16.msra.mxu0 %v491_v18 }
  0x47   :  { %460 = vmatprep.subr.bf16.mxu0 %v573_v1 }
  0x4a   :  { %461 = vmatpush3.bf16.msra.mxu0 %v492_v25 }
  0xff   :  { %v124_v20 = vpop.f32.mrb[0].mxu0 }
 0x100   :  { %v125_v21 = vadd.f32 %v376_v19, %v124_v20  ;;  %v425_v22 = vpop.f32.mrb[1].mxu0 }
 0x102   :  { %v128_v23 = vmax.f32 %v125_v21, 0.0 }
 0x104   :  { %v129_v24 = vpack.c.bf16 %v128_v23, %v128_v23 }
 0x106   :  { %443 = vmatmul.mubr.bf16.vlgmr.msra.gmra.mrb[0].mxu1 %v129_v24 }
 0x1d9   :  { %v228_v26 = vpop.f32.mrb[0].mxu1 }
 0x1da   :  { %v234_v27 = vmax.f32 %v228_v26, 0.0  ;;  %v444_v28 = vpop.f32.mrb[1].mxu1 }
 0x1db   :  { %v231_v29 = vpop.f32.mrb[2].mxu1 }
 0x1dc   :  { %v235_v30 = vpack.c.bf16 %v234_v27, %v234_v27  ;;  %v445_v31 = vpop.f32.mrb[3].mxu1 }
 0x1de   :  { %463 = vmatmul.mubr.bf16.vlgmr.msra.gmra.mrb[4].mxu0 %v235_v30 }
 0x2b1   :  { %v334_v32 = vpop.f32.mrb[4].mxu0 }
 0x2b2   :  { %v464_v33 = vpop.f32.mrb[5].mxu0  ;;  %v340_v34 = vmul.f32 %v334_v32, %v334_v32 }
 0x2b3   :  { %v337_v35 = vpop.f32.mrb[6].mxu0 }
 0x2b4   :  { %v465_v36 = vpop.f32.mrb[7].mxu0  ;;  %341 = vadd.xlane.f32.xlu0 %v340_v34 }
 0x341   :  { %v342_v37 = vpop.xlane.xlu0 %341 }
 0x342   :  { %493 = vrsqrt.f32 %v342_v37  ;;  %vm345_vm2 = vcmp.eq.f32.partialorder %v342_v37, inf  ;;  %v348_v44 = vand.u32 2147483648, %v342_v37  ;;  %vm347_vm3 = vcmp.eq.f32.partialorder %v342_v37, 0.0 }
 0x34c   :  { %v494_v41 = vpop.eup %493 }
 0x34d   :  { %v344_v42 = vmul.f32 %v494_v41, %v342_v37 }
 0x34f   :  { %v346_v45 = vsel %vm345_vm2, %v342_v37, %v344_v42 }
 0x350   :  { %v349_v46 = vsel %vm347_vm3, %v348_v44, %v346_v45 }
 0x351   :  { %v356_v47 = vrot.slane %v349_v46, %v355_v43 }
 0x353   :  { %359 = vst.msk [vmem:[#allocation7] sm:$0x1] %vm358_vm4, %v356_v47 }
 0x354   :  { %550 = shalt.err (!%p547_p6)
}
 0x355   :  { %s551_s16 = scalar_lea.hbm %s644_s3, 16 }
 0x356   :  { %p552_p7 = scmp.ne.s32.totalorder %s644_s3, %s551_s16  ;;  %p555_p8 = scmp.lt.u32.totalorder %s551_s16, %s644_s3 }
 0x358   :  { %p557_p9 = pnand %p555_p8, %p552_p7 }
 0x35a   :  { %560 = shalt.err (!%p557_p9)
}
 0x35b   :  { %369 = dma.vmem_to_hbm [thread:$0]  %s367_s11, 16, %s644_s3, [#allocation4]  }
 0x35c   :  { %565 = dma.done.wait [#allocation4], 16  }
 0x35d   :  { %566 = vsyncadd [#allocation4], 4294967280 }
 0x35e   :  { %373 = vsyncpa [#allocation3], 1 }
 0x35f   :  { %374 = vsyncpa [#allocation6], 1 }
 0x360   :  { %375 = vsyncpa [#allocation4], 1 }

// kernel: tpu_custom_call.1
= control target key start
LH: loop header
LB: loop body
LE: loop exit
PB: predicated region body
PF: predicated region fallthrough
CT: control target
= control target key end

     0   :  { %8 = vsyncpa [#allocation3], 0  ;;  %s641_s0 = inlined_call_operand.hbm [shape: f32[8,16], index: 0, kind: input, shape index: {}]   ;;  %s642_s1 = inlined_call_operand.hbm [shape: bf16[272,128], index: 1, kind: input, shape index: {}]   ;;  %s643_s2 = inlined_call_operand.vmem [shape: f32[1,128], index: 2, kind: input, shape index: {}]   ;;  %s644_s3 = inlined_call_operand.hbm [shape: f32[1,8], index: 3, kind: output, shape index: {}]  }
   0x1   :  { %9 = vsyncpa [#allocation6], 0 }
   0x2   :  { %10 = vsyncpa [#allocation4], 0  ;;  %s567_s12 = smov [#allocation2]   ;;  %s568_s14 = smov [#allocation5]  }
   0x3   :  { %s17_s13 = sshll.u32 %s567_s12, 4  ;;  %s26_s15 = sshll.u32 %s568_s14, 4  ;;  %s18_s13 = int_to_ptr.vmem [resolvable:$true] %s17_s13  ;;  %s595_s15 = int_to_ptr.vmem [resolvable:$true] %s26_s15 }
   0x4   :  { %s495_s18 = scalar_lea.hbm %s641_s0, 128 }
   0x5   :  { %p496_p0 = scmp.ne.s32.totalorder %s641_s0, %s495_s18  ;;  %p499_p1 = scmp.lt.u32.totalorder %s495_s18, %s641_s0 }
   0x7   :  { %p501_p2 = pnand %p499_p1, %p496_p0 }
   0x9   :  { %504 = shalt.err (!%p501_p2)
}
   0xa   :  { %s505_s23 = scalar_lea.vmem %s18_s13, 128  ;;  %p510_p4 = scmp.lt.s32.totalorder %s18_s13, %s18_s13 }
   0xb   :  { %p506_p3 = scmp.ne.s32.totalorder %s18_s13, %s505_s23  ;;  %p511_p5 = scmp.lt.s32.totalorder %s505_s23, %s505_s23 }
   0xd   :  { %p512_p6 = por %p511_p5, %p510_p4 }
   0xf   :  { %p513_p7 = pnand %p512_p6, %p506_p3 }
  0x11   :  { %516 = shalt.err (!%p513_p7)
}
  0x12   :  { %20 = dma.hbm_to_vmem [thread:$0]  %s641_s0, 128, %s18_s13, [#allocation3]  }
  0x13   :  { %s517_s28 = scalar_lea.hbm %s642_s1, 2176 }
  0x14   :  { %p518_p8 = scmp.ne.s32.totalorder %s642_s1, %s517_s28  ;;  %p521_p9 = scmp.lt.u32.totalorder %s517_s28, %s642_s1 }
  0x16   :  { %p523_p10 = pnand %p521_p9, %p518_p8 }
  0x18   :  { %526 = shalt.err (!%p523_p10)
}
  0x19   :  { %s527_s6 = scalar_lea.vmem %s595_s15, 2176  ;;  %p532_p12 = scmp.lt.s32.totalorder %s595_s15, %s595_s15 }
  0x1a   :  { %p528_p11 = scmp.ne.s32.totalorder %s595_s15, %s527_s6  ;;  %p533_p13 = scmp.lt.s32.totalorder %s527_s6, %s527_s6 }
  0x1c   :  { %p534_p0 = por %p533_p13, %p532_p12 }
  0x1e   :  { %p535_p1 = pnand %p534_p0, %p528_p11 }
  0x20   :  { %538 = shalt.err (!%p535_p1)
}
  0x21   :  { %s569_s0 = smov 64   ;;  %s570_s7 = smov 4  }
  0x22   :  { %32 = dma.hbm_to_vmem [thread:$0]  %s642_s1, 2176, %s595_s15, [#allocation6], %s569_s0, %s569_s0, %s570_s7  }
  0x23   :  { %561 = dma.done.wait [#allocation3], 128  }
  0x24   :  { %562 = vsyncadd [#allocation3], 4294967168 }
  0x25   :  { %563 = dma.done.wait [#allocation6], 2176  }
  0x26   :  { %564 = vsyncadd [#allocation6], 4294965120  ;;  %v571_v0 = vmov 0.0|0.0   ;;  %vm572_vm0 = vmmov 0   ;;  %v573_v1 = vmov 0.0   ;;  %v395_v2 = vld [vmem:[#allocation5] sm:$0xff]   ;;  %v351_v38 = vlaneseq }
  0x27   :  { %466 = vmatprep.subr.bf16.mxu0 %v571_v0  ;;  %423 = vmatprep.mubr.msk.f32.mxu0 %vm572_vm0, %v573_v1  ;;  %v42_v3 = vld [vmem:[#allocation2] sm:$0xff]  ;;  %vm54_vm1 = vcmask 130048   ;;  %v477_v4 = vld [vmem:[#allocation5 + $0x8] sm:$0xff]   ;;  %v478_v5 = vld [vmem:[#allocation5 + $0x10] sm:$0xff]   ;;  %vm358_vm4 = vcmask 57344  }
  0x28   :  { %426 = vmatprep.subr.bf16.mxu1 %v573_v1  ;;  %442 = vmatprep.mubr.msk.bf16.mxu1 %vm572_vm0, %v573_v1  ;;  %v479_v6 = vld [vmem:[#allocation5 + $0x18] sm:$0xff]   ;;  %v480_v7 = vld [vmem:[#allocation5 + $0x20] sm:$0xff]   ;;  %v481_v8 = vld [vmem:[#allocation5 + $0x28] sm:$0xff]   ;;  %v352_v39 = vand.u32 127, %v351_v38  ;;  %v354_v40 = vshrl.u32 %v351_v38, 7 }
  0x29   :  { %468 = vmatpush3.bf16.msra.mxu0 %v395_v2  ;;  %427 = vmatpush3.bf16.msra.mxu1 %v477_v4  ;;  %v482_v9 = vld [vmem:[#allocation5 + $0x30] sm:$0xff]   ;;  %v483_v10 = vld [vmem:[#allocation5 + $0x38] sm:$0xff]   ;;  %v484_v11 = vld [vmem:[#allocation5 + $0x40] sm:$0xff]  }
  0x2a   :  { %446 = vmatprep.subr.bf16.mxu0 %v573_v1  ;;  %428 = vmatprep.subr.bf16.mxu1 %v573_v1  ;;  %v485_v12 = vld [vmem:[#allocation5 + $0x48] sm:$0xff]   ;;  %v486_v13 = vld [vmem:[#allocation5 + $0x50] sm:$0xff]   ;;  %v487_v14 = vld [vmem:[#allocation5 + $0x58] sm:$0xff]   ;;  %v355_v43 = vsub.s32 %v352_v39, %v354_v40 }
  0x2b   :  { %v488_v15 = vld [vmem:[#allocation5 + $0x60] sm:$0xff]   ;;  %v489_v16 = vld [vmem:[#allocation5 + $0x68] sm:$0xff]   ;;  %v490_v17 = vld [vmem:[#allocation5 + $0x70] sm:$0xff]  }
  0x2c   :  { %424 = vmatmul.mubr.msk.f32.vlgmr.msra.gmra.mrb[0].mxu0 %vm54_vm1, %v42_v3  ;;  %v491_v18 = vld [vmem:[#allocation5 + $0x78] sm:$0xff]   ;;  %v492_v25 = vld [vmem:[#allocation5 + $0x80] sm:$0xff]  }
  0x2d   :  { %462 = vmatprep.mubr.msk.bf16.mxu0 %vm572_vm0, %v573_v1  ;;  %429 = vmatpush3.bf16.msra.mxu1 %v478_v5  ;;  %v376_v19 = vld [vmem:[%s643_s2] ss:$0 sm:$0xff]  ;;  %s574_s2 = smov [#allocation7]  }
  0x2e   :  { %430 = vmatprep.subr.bf16.mxu1 %v573_v1  ;;  %447 = vmatpush3.bf16.msra.mxu0 %v485_v12  ;;  %s366_s11 = sshll.u32 %s574_s2, 4  ;;  %s367_s11 = int_to_ptr.vmem [resolvable:$true] %s366_s11 }
  0x2f   :  { %448 = vmatprep.subr.bf16.mxu0 %v573_v1  ;;  %s539_s12 = scalar_lea.vmem %s367_s11, 16  ;;  %s543_s13 = scalar_lea.vmem %s367_s11, 32 }
  0x30   :  { %p540_p2 = scmp.ne.s32.totalorder %s367_s11, %s539_s12  ;;  %p544_p3 = scmp.lt.s32.totalorder %s367_s11, %s367_s11 }
  0x31   :  { %431 = vmatpush3.bf16.msra.mxu1 %v479_v6  ;;  %p545_p4 = scmp.lt.s32.totalorder %s543_s13, %s539_s12 }
  0x32   :  { %432 = vmatprep.subr.bf16.mxu1 %v573_v1  ;;  %449 = vmatpush3.bf16.msra.mxu0 %v486_v13 }
  0x33   :  { %450 = vmatprep.subr.bf16.mxu0 %v573_v1  ;;  %p546_p5 = por %p545_p4, %p544_p3 }
  0x35   :  { %433 = vmatpush3.bf16.msra.mxu1 %v480_v7  ;;  %p547_p6 = pnand %p546_p5, %p540_p2 }
  0x36   :  { %434 = vmatprep.subr.bf16.mxu1 %v573_v1  ;;  %451 = vmatpush3.bf16.msra.mxu0 %v487_v14 }
  0x37   :  { %452 = vmatprep.subr.bf16.mxu0 %v573_v1 }
  0x39   :  { %435 = vmatpush3.bf16.msra.mxu1 %v481_v8 }
  0x3a   :  { %436 = vmatprep.subr.bf16.mxu1 %v573_v1  ;;  %453 = vmatpush3.bf16.msra.mxu0 %v488_v15 }
  0x3b   :  { %454 = vmatprep.subr.bf16.mxu0 %v573_v1 }
  0x3d   :  { %437 = vmatpush3.bf16.msra.mxu1 %v482_v9 }
  0x3e   :  { %438 = vmatprep.subr.bf16.mxu1 %v573_v1  ;;  %455 = vmatpush3.bf16.msra.mxu0 %v489_v16 }
  0x3f   :  { %456 = vmatprep.subr.bf16.mxu0 %v573_v1 }
  0x41   :  { %439 = vmatpush3.bf16.msra.mxu1 %v483_v10 }
  0x42   :  { %440 = vmatprep.subr.bf16.mxu1 %v573_v1  ;;  %457 = vmatpush3.bf16.msra.mxu0 %v490_v17 }
  0x43   :  { %458 = vmatprep.subr.bf16.mxu0 %v573_v1 }
  0x45   :  { %441 = vmatpush3.bf16.msra.mxu1 %v484_v11 }
  0x46   :  { %459 = vmatpush3.bf16.msra.mxu0 %v491_v18 }
  0x47   :  { %460 = vmatprep.subr.bf16.mxu0 %v573_v1 }
  0x4a   :  { %461 = vmatpush3.bf16.msra.mxu0 %v492_v25 }
  0xff   :  { %v124_v20 = vpop.f32.mrb[0].mxu0 }
 0x100   :  { %v125_v21 = vadd.f32 %v376_v19, %v124_v20  ;;  %v425_v22 = vpop.f32.mrb[1].mxu0 }
 0x102   :  { %v128_v23 = vmax.f32 %v125_v21, 0.0 }
 0x104   :  { %v129_v24 = vpack.c.bf16 %v128_v23, %v128_v23 }
 0x106   :  { %443 = vmatmul.mubr.bf16.vlgmr.msra.gmra.mrb[0].mxu1 %v129_v24 }
 0x1d9   :  { %v228_v26 = vpop.f32.mrb[0].mxu1 }
 0x1da   :  { %v234_v27 = vmax.f32 %v228_v26, 0.0  ;;  %v444_v28 = vpop.f32.mrb[1].mxu1 }
 0x1db   :  { %v231_v29 = vpop.f32.mrb[2].mxu1 }
 0x1dc   :  { %v235_v30 = vpack.c.bf16 %v234_v27, %v234_v27  ;;  %v445_v31 = vpop.f32.mrb[3].mxu1 }
 0x1de   :  { %463 = vmatmul.mubr.bf16.vlgmr.msra.gmra.mrb[4].mxu0 %v235_v30 }
 0x2b1   :  { %v334_v32 = vpop.f32.mrb[4].mxu0 }
 0x2b2   :  { %v464_v33 = vpop.f32.mrb[5].mxu0  ;;  %v340_v34 = vmul.f32 %v334_v32, %v334_v32 }
 0x2b3   :  { %v337_v35 = vpop.f32.mrb[6].mxu0 }
 0x2b4   :  { %v465_v36 = vpop.f32.mrb[7].mxu0  ;;  %341 = vadd.xlane.f32.xlu0 %v340_v34 }
 0x341   :  { %v342_v37 = vpop.xlane.xlu0 %341 }
 0x342   :  { %493 = vrsqrt.f32 %v342_v37  ;;  %vm345_vm2 = vcmp.eq.f32.partialorder %v342_v37, inf  ;;  %v348_v44 = vand.u32 2147483648, %v342_v37  ;;  %vm347_vm3 = vcmp.eq.f32.partialorder %v342_v37, 0.0 }
 0x34c   :  { %v494_v41 = vpop.eup %493 }
 0x34d   :  { %v344_v42 = vmul.f32 %v494_v41, %v342_v37 }
 0x34f   :  { %v346_v45 = vsel %vm345_vm2, %v342_v37, %v344_v42 }
 0x350   :  { %v349_v46 = vsel %vm347_vm3, %v348_v44, %v346_v45 }
 0x351   :  { %v356_v47 = vrot.slane %v349_v46, %v355_v43 }
 0x353   :  { %359 = vst.msk [vmem:[#allocation7] sm:$0x1] %vm358_vm4, %v356_v47 }
 0x354   :  { %550 = shalt.err (!%p547_p6)
}
 0x355   :  { %s551_s16 = scalar_lea.hbm %s644_s3, 16 }
 0x356   :  { %p552_p7 = scmp.ne.s32.totalorder %s644_s3, %s551_s16  ;;  %p555_p8 = scmp.lt.u32.totalorder %s551_s16, %s644_s3 }
 0x358   :  { %p557_p9 = pnand %p555_p8, %p552_p7 }
 0x35a   :  { %560 = shalt.err (!%p557_p9)
}
 0x35b   :  { %369 = dma.vmem_to_hbm [thread:$0]  %s367_s11, 16, %s644_s3, [#allocation4]  }
 0x35c   :  { %565 = dma.done.wait [#allocation4], 16  }
 0x35d   :  { %566 = vsyncadd [#allocation4], 4294967280 }
 0x35e   :  { %373 = vsyncpa [#allocation3], 1 }
 0x35f   :  { %374 = vsyncpa [#allocation6], 1 }
 0x360   :  { %375 = vsyncpa [#allocation4], 1 }

</bundles_post_ra>
